<compile_context>
chip_gen: v7x
topology: tpu7x:2x2x1
jax: 0.10.0
libtpu: 0.0.40
codegen_flags: <defaults>
</compile_context>

<pallas_src>
import functools

import jax
import jax.numpy as jnp
from jax.experimental import pallas as pl
from jax.experimental.pallas import tpu as pltpu


def _round_up(n, m):
    return ((n + m - 1) // m) * m


def _fused_mlp_kernel(*refs, num_hidden):
    if num_hidden > 0:
        (x_ref, w_in_ref, b_in_ref, w_hid_ref, b_hid_ref,
         w_out_ref, b_out_ref, o_ref) = refs
    else:
        x_ref, w_in_ref, b_in_ref, w_out_ref, b_out_ref, o_ref = refs
        w_hid_ref = b_hid_ref = None

    # Input layer: (TM, Din_p) bf16 @ (Din_p, Dw) bf16 -> f32 (TM, Dw).
    h = jnp.dot(x_ref[...], w_in_ref[...],
                preferred_element_type=jnp.float32) + b_in_ref[...]

    # Hidden layers (static unroll: depth is tiny), bf16 operands, f32 acc.
    for l in range(num_hidden):
        h = jnp.dot(h.astype(w_hid_ref.dtype), w_hid_ref[l],
                    preferred_element_type=jnp.float32) + b_hid_ref[l]

    # Output layer writes the narrow lane-dense slab (TM, Dout_p).
    h = jnp.dot(h.astype(w_out_ref.dtype), w_out_ref[...],
                preferred_element_type=jnp.float32) + b_out_ref[...]
    o_ref[...] = h.astype(o_ref.dtype)


def init_mlp_params(key, width, depth, in_features, out_features):
    """Deterministic init matching nn.Linear shapes: W (out, in), b (out,)."""
    dims = [in_features] + [width] * (depth + 1) + [out_features]
    params = []
    for i in range(len(dims) - 1):
        fan_in, fan_out = dims[i], dims[i + 1]
        key, kw, kb = jax.random.split(key, 3)
        bound = 1.0 / (fan_in ** 0.5)  # PyTorch default uniform(-1/sqrt(fan_in), ...)
        w = jax.random.uniform(kw, (fan_out, fan_in), jnp.float32, -bound, bound)
        b = jax.random.uniform(kb, (fan_out,), jnp.float32, -bound, bound)
        params.append((w, b))
    return params


def pack_mlp_params(params, weight_dtype=jnp.bfloat16):
    """Pack PyTorch-layout Linear params for the fused kernel.

    Pre-transpose to (IN, OUT), pad each layer only to ITS lane-aligned dims
    (boundary layers keep their own 128-multiple, hidden layers share Dw),
    cast weights to bf16 (biases stay f32).  Call ONCE at init; the packed
    slabs are reused by every forward call.
    """
    in_features = params[0][0].shape[1]
    width = params[0][0].shape[0]
    out_features = params[-1][0].shape[0]
    num_hidden = len(params) - 2

    Din_p = _round_up(in_features, 128)
    Dw = _round_up(width, 128)
    Dout_p = _round_up(out_features, 128)

    w0, b0 = params[0]
    w_in = jnp.zeros((Din_p, Dw), weight_dtype).at[:in_features, :width].set(
        w0.T.astype(weight_dtype))
    b_in = jnp.zeros((1, Dw), jnp.float32).at[0, :width].set(b0.astype(jnp.float32))

    if num_hidden > 0:
        w_hid = jnp.zeros((num_hidden, Dw, Dw), weight_dtype)
        b_hid = jnp.zeros((num_hidden, 1, Dw), jnp.float32)
        for l in range(num_hidden):
            w, b = params[1 + l]
            w_hid = w_hid.at[l, :width, :width].set(w.T.astype(weight_dtype))
            b_hid = b_hid.at[l, 0, :width].set(b.astype(jnp.float32))
    else:
        w_hid = b_hid = None

    wl, bl = params[-1]
    w_out = jnp.zeros((Dw, Dout_p), weight_dtype).at[:width, :out_features].set(
        wl.T.astype(weight_dtype))
    b_out = jnp.zeros((1, Dout_p), jnp.float32).at[0, :out_features].set(
        bl.astype(jnp.float32))

    return dict(
        w_in=w_in, b_in=b_in, w_hid=w_hid, b_hid=b_hid,
        w_out=w_out, b_out=b_out,
        in_features=in_features, width=width, out_features=out_features,
        num_hidden=num_hidden, Din_p=Din_p, Dw=Dw, Dout_p=Dout_p,
    )


def mlp_forward(x, packed):
    """Forward pass: y = (((x W0^T + b0) W1^T + b1) ...), no activations."""
    B, in_f = x.shape
    assert in_f == packed["in_features"]
    Din_p, Dw, Dout_p = packed["Din_p"], packed["Dw"], packed["Dout_p"]
    num_hidden = packed["num_hidden"]
    out_f = packed["out_features"]

    # Batch tile: multiple of 16 (bf16 sublane packing), up to 512 to amortize
    # per-grid-step overhead.  Keep >=2 grid steps when the batch is large
    # enough so v7x's second TensorCore has work (no-op on v5e/v6e).
    TM = min(512, _round_up(B, 16))
    if B >= 32 and _round_up(B, TM) // TM < 2:
        TM = _round_up((B + 1) // 2, 16)
    Bp = _round_up(B, TM)

    x_pad = jnp.zeros((Bp, Din_p), jnp.bfloat16).at[:B, :in_f].set(
        x.astype(jnp.bfloat16))

    resident = pl.Buffered(1)  # constant index_map -> no double buffer needed

    in_specs = [
        pl.BlockSpec((TM, Din_p), lambda i: (i, 0)),                       # activation tile
        pl.BlockSpec((Din_p, Dw), lambda i: (0, 0), pipeline_mode=resident),
        pl.BlockSpec((1, Dw), lambda i: (0, 0), pipeline_mode=resident),
    ]
    operands = [x_pad, packed["w_in"], packed["b_in"]]
    if num_hidden > 0:
        in_specs += [
            pl.BlockSpec((num_hidden, Dw, Dw), lambda i: (0, 0, 0),
                         pipeline_mode=resident),
            pl.BlockSpec((num_hidden, 1, Dw), lambda i: (0, 0, 0),
                         pipeline_mode=resident),
        ]
        operands += [packed["w_hid"], packed["b_hid"]]
    in_specs += [
        pl.BlockSpec((Dw, Dout_p), lambda i: (0, 0), pipeline_mode=resident),
        pl.BlockSpec((1, Dout_p), lambda i: (0, 0), pipeline_mode=resident),
    ]
    operands += [packed["w_out"], packed["b_out"]]

    # Explicit VMEM budget: bf16 weights single-buffered + double-buffered
    # activation/output tiles + f32 intermediate.  Cap so it also fits v7x.
    w_bytes = 2 * (Din_p * Dw + num_hidden * Dw * Dw + Dw * Dout_p)
    b_bytes = 4 * (Dw + num_hidden * Dw + Dout_p)
    act_bytes = 2 * TM * Din_p * 2 + 2 * TM * Dout_p * 4 + 2 * TM * Dw * 4
    vmem_limit = min(
        48 << 20,
        max(16 << 20, int(1.5 * (w_bytes + b_bytes + act_bytes)) + (4 << 20)),
    )

    kernel = functools.partial(_fused_mlp_kernel, num_hidden=num_hidden)

    out_pad = pl.pallas_call(
        kernel,
        out_shape=jax.ShapeDtypeStruct((Bp, Dout_p), jnp.float32),
        grid=(Bp // TM,),
        in_specs=in_specs,
        out_specs=pl.BlockSpec((TM, Dout_p), lambda i: (i, 0)),  # narrow, lane-dense
        compiler_params=pltpu.CompilerParams(
            dimension_semantics=("parallel",),  # batch split across TCs (v7x)
            vmem_limit_bytes=vmem_limit,
        ),
    )(*operands)

    return out_pad[:B, :out_f]


if __name__ == "__main__":
    key = jax.random.PRNGKey(0)

    width, depth = 32, 2
    in_features, out_features = 16, 8
    batch = 4

    kx, kp = jax.random.split(key)
    x = jax.random.normal(kx, (batch, in_features), jnp.float32)
    params = init_mlp_params(kp, width, depth, in_features, out_features)

    # Pack ONCE (hoisted out of the per-call path), reuse for every forward.
    packed = pack_mlp_params(params)

    out = mlp_forward(x, packed)
    jax.block_until_ready(out)

    # Sanity check against plain-JAX f32 reference (PyTorch semantics: x @ W^T + b).
    ref = x
    for w, b in params:
        ref = ref @ w.T + b

    assert out.shape == (batch, out_features)
    max_err = float(jnp.max(jnp.abs(out - ref)))
    # bf16 weights/activations with f32 accumulation: tolerance loosened vs f32 ref.
    assert jnp.allclose(out, ref, atol=5e-2, rtol=5e-2), f"max_err={max_err}"

    print("KERNEL_OK")
</pallas_src>

<mosaic_0001>
module attributes {stable_mosaic.version = 11 : i64} {
  func.func @_fused_mlp_kernel(%arg0: i32, %arg1: memref<16x128xbf16, #tpu.memory_space<vmem>>, %arg2: memref<128x128xbf16, #tpu.memory_space<vmem>>, %arg3: memref<1x128xf32, #tpu.memory_space<vmem>>, %arg4: memref<2x128x128xbf16, #tpu.memory_space<vmem>>, %arg5: memref<2x1x128xf32, #tpu.memory_space<vmem>>, %arg6: memref<128x128xbf16, #tpu.memory_space<vmem>>, %arg7: memref<1x128xf32, #tpu.memory_space<vmem>>, %arg8: memref<16x128xf32, #tpu.memory_space<vmem>>) attributes {dimension_semantics = [#tpu.dimension_semantics<parallel>], iteration_bounds = array<i64: 1>, scalar_prefetch = 0 : i64, scratch_operands = 0 : i64, tpu.core_type = #tpu.core_type<tc>, window_params = [{transform_indices = @transform_0, window_bounds = array<i64: 16, 128>}, {pipeline_mode = #tpu.pipeline_mode<synchronous>, transform_indices = @transform_1, window_bounds = array<i64: 128, 128>}, {pipeline_mode = #tpu.pipeline_mode<synchronous>, transform_indices = @transform_2, window_bounds = array<i64: 1, 128>}, {pipeline_mode = #tpu.pipeline_mode<synchronous>, transform_indices = @transform_3, window_bounds = array<i64: 2, 128, 128>}, {pipeline_mode = #tpu.pipeline_mode<synchronous>, transform_indices = @transform_4, window_bounds = array<i64: 2, 1, 128>}, {pipeline_mode = #tpu.pipeline_mode<synchronous>, transform_indices = @transform_5, window_bounds = array<i64: 128, 128>}, {pipeline_mode = #tpu.pipeline_mode<synchronous>, transform_indices = @transform_6, window_bounds = array<i64: 1, 128>}, {transform_indices = @transform_7, window_bounds = array<i64: 16, 128>}]} {
    %c0 = arith.constant 0 : index
    %c0_0 = arith.constant 0 : index
    %0 = vector.load %arg1[%c0, %c0_0] : memref<16x128xbf16, #tpu.memory_space<vmem>>, vector<16x128xbf16>
    %c0_1 = arith.constant 0 : index
    %c0_2 = arith.constant 0 : index
    %1 = vector.load %arg2[%c0_1, %c0_2] : memref<128x128xbf16, #tpu.memory_space<vmem>>, vector<128x128xbf16>
    %cst = arith.constant dense<0.000000e+00> : vector<16x128xf32>
    %2 = tpu.matmul %0, %1, %cst {dimension_numbers = #tpu.dot_dimension_numbers<[1], [0], [0], [1], [0, 0, 1, 1], [], []>} : vector<16x128xbf16>, vector<128x128xbf16>, vector<16x128xf32> -> vector<16x128xf32>
    %c0_3 = arith.constant 0 : index
    %c0_4 = arith.constant 0 : index
    %3 = vector.load %arg3[%c0_3, %c0_4] : memref<1x128xf32, #tpu.memory_space<vmem>>, vector<1x128xf32>
    %4 = vector.broadcast %3 : vector<1x128xf32> to vector<16x128xf32>
    %5 = arith.addf %2, %4 : vector<16x128xf32>
    %6 = arith.truncf %5 : vector<16x128xf32> to vector<16x128xbf16>
    %c0_5 = arith.constant 0 : index
    %c0_6 = arith.constant 0 : index
    %c0_7 = arith.constant 0 : index
    %7 = vector.load %arg4[%c0_5, %c0_6, %c0_7] : memref<2x128x128xbf16, #tpu.memory_space<vmem>>, vector<1x128x128xbf16>
    %8 = vector.shape_cast %7 : vector<1x128x128xbf16> to vector<128x128xbf16>
    %cst_8 = arith.constant dense<0.000000e+00> : vector<16x128xf32>
    %9 = tpu.matmul %6, %8, %cst_8 {dimension_numbers = #tpu.dot_dimension_numbers<[1], [0], [0], [1], [0, 0, 1, 1], [], []>} : vector<16x128xbf16>, vector<128x128xbf16>, vector<16x128xf32> -> vector<16x128xf32>
    %c0_9 = arith.constant 0 : index
    %c0_10 = arith.constant 0 : index
    %c0_11 = arith.constant 0 : index
    %10 = vector.load %arg5[%c0_9, %c0_10, %c0_11] : memref<2x1x128xf32, #tpu.memory_space<vmem>>, vector<1x1x128xf32>
    %11 = vector.shape_cast %10 : vector<1x1x128xf32> to vector<1x128xf32>
    %12 = vector.broadcast %11 : vector<1x128xf32> to vector<16x128xf32>
    %13 = arith.addf %9, %12 : vector<16x128xf32>
    %14 = arith.truncf %13 : vector<16x128xf32> to vector<16x128xbf16>
    %c1 = arith.constant 1 : index
    %c0_12 = arith.constant 0 : index
    %c0_13 = arith.constant 0 : index
    %15 = vector.load %arg4[%c1, %c0_12, %c0_13] : memref<2x128x128xbf16, #tpu.memory_space<vmem>>, vector<1x128x128xbf16>
    %16 = vector.shape_cast %15 : vector<1x128x128xbf16> to vector<128x128xbf16>
    %cst_14 = arith.constant dense<0.000000e+00> : vector<16x128xf32>
    %17 = tpu.matmul %14, %16, %cst_14 {dimension_numbers = #tpu.dot_dimension_numbers<[1], [0], [0], [1], [0, 0, 1, 1], [], []>} : vector<16x128xbf16>, vector<128x128xbf16>, vector<16x128xf32> -> vector<16x128xf32>
    %c1_15 = arith.constant 1 : index
    %c0_16 = arith.constant 0 : index
    %c0_17 = arith.constant 0 : index
    %18 = vector.load %arg5[%c1_15, %c0_16, %c0_17] : memref<2x1x128xf32, #tpu.memory_space<vmem>>, vector<1x1x128xf32>
    %19 = vector.shape_cast %18 : vector<1x1x128xf32> to vector<1x128xf32>
    %20 = vector.broadcast %19 : vector<1x128xf32> to vector<16x128xf32>
    %21 = arith.addf %17, %20 : vector<16x128xf32>
    %22 = arith.truncf %21 : vector<16x128xf32> to vector<16x128xbf16>
    %c0_18 = arith.constant 0 : index
    %c0_19 = arith.constant 0 : index
    %23 = vector.load %arg6[%c0_18, %c0_19] : memref<128x128xbf16, #tpu.memory_space<vmem>>, vector<128x128xbf16>
    %cst_20 = arith.constant dense<0.000000e+00> : vector<16x128xf32>
    %24 = tpu.matmul %22, %23, %cst_20 {dimension_numbers = #tpu.dot_dimension_numbers<[1], [0], [0], [1], [0, 0, 1, 1], [], []>} : vector<16x128xbf16>, vector<128x128xbf16>, vector<16x128xf32> -> vector<16x128xf32>
    %c0_21 = arith.constant 0 : index
    %c0_22 = arith.constant 0 : index
    %25 = vector.load %arg7[%c0_21, %c0_22] : memref<1x128xf32, #tpu.memory_space<vmem>>, vector<1x128xf32>
    %26 = vector.broadcast %25 : vector<1x128xf32> to vector<16x128xf32>
    %27 = arith.addf %24, %26 : vector<16x128xf32>
    %c0_23 = arith.constant 0 : index
    %c0_24 = arith.constant 0 : index
    %28 = vector.load %arg8[%c0_23, %c0_24] : memref<16x128xf32, #tpu.memory_space<vmem>>, vector<16x128xf32>
    tpu.vector_store %arg8[%c0_23, %c0_24], %27 {strides = array<i32>} : memref<16x128xf32, #tpu.memory_space<vmem>>, vector<16x128xf32>,
    return
  }
  func.func @transform_0(%arg0: i32) -> (i32, i32) {
    %c0_i32 = arith.constant 0 : i32
    %c0_i32_0 = arith.constant 0 : i32
    return %arg0, %c0_i32 : i32, i32
  }
  func.func @transform_1(%arg0: i32) -> (i32, i32) {
    %c0_i32 = arith.constant 0 : i32
    %c0_i32_0 = arith.constant 0 : i32
    %c0_i32_1 = arith.constant 0 : i32
    return %c0_i32, %c0_i32_0 : i32, i32
  }
  func.func @transform_2(%arg0: i32) -> (i32, i32) {
    %c0_i32 = arith.constant 0 : i32
    %c0_i32_0 = arith.constant 0 : i32
    %c0_i32_1 = arith.constant 0 : i32
    return %c0_i32, %c0_i32_0 : i32, i32
  }
  func.func @transform_3(%arg0: i32) -> (i32, i32, i32) {
    %c0_i32 = arith.constant 0 : i32
    %c0_i32_0 = arith.constant 0 : i32
    %c0_i32_1 = arith.constant 0 : i32
    %c0_i32_2 = arith.constant 0 : i32
    return %c0_i32, %c0_i32_0, %c0_i32_1 : i32, i32, i32
  }
  func.func @transform_4(%arg0: i32) -> (i32, i32, i32) {
    %c0_i32 = arith.constant 0 : i32
    %c0_i32_0 = arith.constant 0 : i32
    %c0_i32_1 = arith.constant 0 : i32
    %c0_i32_2 = arith.constant 0 : i32
    return %c0_i32, %c0_i32_0, %c0_i32_1 : i32, i32, i32
  }
  func.func @transform_5(%arg0: i32) -> (i32, i32) {
    %c0_i32 = arith.constant 0 : i32
    %c0_i32_0 = arith.constant 0 : i32
    %c0_i32_1 = arith.constant 0 : i32
    return %c0_i32, %c0_i32_0 : i32, i32
  }
  func.func @transform_6(%arg0: i32) -> (i32, i32) {
    %c0_i32 = arith.constant 0 : i32
    %c0_i32_0 = arith.constant 0 : i32
    %c0_i32_1 = arith.constant 0 : i32
    return %c0_i32, %c0_i32_0 : i32, i32
  }
  func.func @transform_7(%arg0: i32) -> (i32, i32) {
    %c0_i32 = arith.constant 0 : i32
    %c0_i32_0 = arith.constant 0 : i32
    return %arg0, %c0_i32 : i32, i32
  }
}

</mosaic_0001>

<bundles_post_ra>
// kernel: tpu_custom_call.1
= control target key start
LH: loop header
LB: loop body
LE: loop exit
PB: predicated region body
PF: predicated region fallthrough
CT: control target
= control target key end

     0   :  { %12 = vsyncpa [#allocation3], 0  ;;  %s1070_s0 = inlined_call_operand.hbm [shape: bf16[16,128], index: 0, kind: input, shape index: {}]   ;;  %s1071_s1 = inlined_call_operand.hbm [shape: bf16[128,128], index: 1, kind: input, shape index: {}]   ;;  %s1072_s2 = inlined_call_operand.vmem [shape: f32[1,128], index: 2, kind: input, shape index: {}]   ;;  %s1073_s3 = inlined_call_operand.hbm [shape: bf16[2,128,128], index: 3, kind: input, shape index: {}]   ;;  %s1074_s4 = inlined_call_operand.vmem [shape: f32[2,1,128], index: 4, kind: input, shape index: {}]   ;;  %s1075_s5 = inlined_call_operand.hbm [shape: bf16[128,128], index: 5, kind: input, shape index: {}]   ;;  %s1076_s6 = inlined_call_operand.vmem [shape: f32[1,128], index: 6, kind: input, shape index: {}]   ;;  %s1077_s7 = inlined_call_operand.hbm [shape: f32[16,128], index: 7, kind: output, shape index: {}]  }
   0x1   :  { %13 = vsyncpa [#allocation6], 0 }
   0x2   :  { %14 = vsyncpa [#allocation9], 0 }
   0x3   :  { %15 = vsyncpa [#allocation4], 0  ;;  %s881_s24 = smov [#allocation5]   ;;  %s882_s26 = smov [#allocation2]  }
   0x4   :  { %s33_s25 = sshll.u32 %s881_s24, 4  ;;  %s21_s27 = sshll.u32 %s882_s26, 4  ;;  %s34_s25 = int_to_ptr.vmem [resolvable:$true] %s33_s25  ;;  %s932_s27 = int_to_ptr.vmem [resolvable:$true] %s21_s27 }
   0x5   :  { %s763_s30 = scalar_lea.hbm %s1071_s1, 1024 }
   0x6   :  { %p764_p0 = scmp.ne.s32.totalorder %s1071_s1, %s763_s30  ;;  %p767_p1 = scmp.lt.u32.totalorder %s763_s30, %s1071_s1 }
   0x8   :  { %p769_p2 = pnand %p767_p1, %p764_p0 }
   0xa   :  { %772 = shalt.err (!%p769_p2)
}
   0xb   :  { %s773_s12 = scalar_lea.vmem %s34_s25, 1024  ;;  %p778_p4 = scmp.lt.s32.totalorder %s34_s25, %s34_s25 }
   0xc   :  { %p774_p3 = scmp.ne.s32.totalorder %s34_s25, %s773_s12  ;;  %p779_p5 = scmp.lt.s32.totalorder %s773_s12, %s773_s12 }
   0xe   :  { %p780_p6 = por %p779_p5, %p778_p4 }
  0x10   :  { %p781_p7 = pnand %p780_p6, %p774_p3 }
  0x12   :  { %784 = shalt.err (!%p781_p7)
}
  0x13   :  { %s883_s13 = smov 64   ;;  %s884_s14 = smov 4  }
  0x14   :  { %39 = dma.hbm_to_vmem [thread:$0]  %s1071_s1, 1024, %s34_s25, [#allocation6], %s883_s13, %s883_s13, %s884_s14  }
  0x15   :  { %s785_s19 = scalar_lea.hbm %s1070_s0, 128 }
  0x16   :  { %p786_p8 = scmp.ne.s32.totalorder %s1070_s0, %s785_s19  ;;  %p789_p9 = scmp.lt.u32.totalorder %s785_s19, %s1070_s0 }
  0x18   :  { %p791_p10 = pnand %p789_p9, %p786_p8 }
  0x1a   :  { %794 = shalt.err (!%p791_p10)
}
  0x1b   :  { %s795_s24 = scalar_lea.vmem %s932_s27, 128  ;;  %p800_p12 = scmp.lt.s32.totalorder %s932_s27, %s932_s27 }
  0x1c   :  { %p796_p11 = scmp.ne.s32.totalorder %s932_s27, %s795_s24  ;;  %p801_p13 = scmp.lt.s32.totalorder %s795_s24, %s795_s24 }
  0x1e   :  { %p802_p0 = por %p801_p13, %p800_p12 }
  0x20   :  { %p803_p1 = pnand %p802_p0, %p796_p11 }
  0x22   :  { %806 = shalt.err (!%p803_p1)
}
  0x23   :  { %27 = dma.hbm_to_vmem [thread:$0]  %s1070_s0, 128, %s932_s27, [#allocation3], %s883_s13, %s883_s13, %s884_s14  }
  0x24   :  { %s885_s26 = smov [#allocation7]   ;;  %s886_s29 = smov [#allocation8]  }
  0x25   :  { %s47_s28 = sshll.u32 %s885_s26, 4  ;;  %s61_s30 = sshll.u32 %s886_s29, 4  ;;  %s48_s28 = int_to_ptr.vmem [resolvable:$true] %s47_s28  ;;  %s969_s30 = int_to_ptr.vmem [resolvable:$true] %s61_s30 }
  0x26   :  { %s807_s10 = scalar_lea.hbm %s1073_s3, 2048 }
  0x27   :  { %p808_p2 = scmp.ne.s32.totalorder %s1073_s3, %s807_s10  ;;  %p811_p3 = scmp.lt.u32.totalorder %s807_s10, %s1073_s3 }
  0x29   :  { %p813_p4 = pnand %p811_p3, %p808_p2 }
  0x2b   :  { %816 = shalt.err (!%p813_p4)
}
  0x2c   :  { %s817_s0 = scalar_lea.vmem %s48_s28, 2048  ;;  %p822_p6 = scmp.lt.s32.totalorder %s48_s28, %s48_s28 }
  0x2d   :  { %p818_p5 = scmp.ne.s32.totalorder %s48_s28, %s817_s0  ;;  %p823_p7 = scmp.lt.s32.totalorder %s817_s0, %s817_s0 }
  0x2f   :  { %p824_p8 = por %p823_p7, %p822_p6 }
  0x31   :  { %p825_p9 = pnand %p824_p8, %p818_p5 }
  0x33   :  { %828 = shalt.err (!%p825_p9)
}
  0x34   :  { %53 = dma.hbm_to_vmem [thread:$0]  %s1073_s3, 2048, %s48_s28, [#allocation6], %s883_s13, %s883_s13, %s884_s14  }
  0x35   :  { %s829_s20 = scalar_lea.hbm %s1075_s5, 1024 }
  0x36   :  { %p830_p10 = scmp.ne.s32.totalorder %s1075_s5, %s829_s20  ;;  %p833_p11 = scmp.lt.u32.totalorder %s829_s20, %s1075_s5 }
  0x38   :  { %p835_p12 = pnand %p833_p11, %p830_p10 }
  0x3a   :  { %838 = shalt.err (!%p835_p12)
}
  0x3b   :  { %s839_s1 = scalar_lea.vmem %s969_s30, 1024  ;;  %p844_p0 = scmp.lt.s32.totalorder %s969_s30, %s969_s30 }
  0x3c   :  { %p840_p13 = scmp.ne.s32.totalorder %s969_s30, %s839_s1  ;;  %p845_p1 = scmp.lt.s32.totalorder %s839_s1, %s839_s1 }
  0x3e   :  { %p846_p2 = por %p845_p1, %p844_p0 }
  0x40   :  { %p847_p3 = pnand %p846_p2, %p840_p13 }
  0x42   :  { %850 = shalt.err (!%p847_p3)
}
  0x43   :  { %67 = dma.hbm_to_vmem [thread:$0]  %s1075_s5, 1024, %s969_s30, [#allocation9], %s883_s13, %s883_s13, %s884_s14  }
  0x44   :  { %873 = dma.done.wait [#allocation3], 128  }
  0x45   :  { %874 = vsyncadd [#allocation3], 4294967168 }
  0x46   :  { %875 = dma.done.wait [#allocation6], 3072  }
  0x47   :  { %876 = vsyncadd [#allocation6], 4294964224 }
  0x48   :  { %877 = dma.done.wait [#allocation9], 1024  }
  0x49   :  { %878 = vsyncadd [#allocation9], 4294966272  ;;  %v887_v0 = vmov 0.0   ;;  %vm888_vm0 = vmmov 0   ;;  %v730_v1 = vld [vmem:[#allocation5] sm:$0xff]   ;;  %v731_v2 = vld [vmem:[#allocation5 + $0x8] sm:$0xff]  }
  0x4a   :  { %639 = vmatprep.subr.bf16.mxu0 %v887_v0  ;;  %655 = vmatprep.mubr.msk.bf16.mxu0 %vm888_vm0, %v887_v0  ;;  %v732_v3 = vld [vmem:[#allocation5 + $0x10] sm:$0xff]   ;;  %v739_v4 = vld [vmem:[#allocation7] sm:$0xff]   ;;  %v733_v5 = vld [vmem:[#allocation5 + $0x18] sm:$0xff]   ;;  %s889_s8 = smov [#allocation10]  }
  0x4b   :  { %659 = vmatprep.subr.bf16.mxu1 %v887_v0  ;;  %675 = vmatprep.mubr.msk.bf16.mxu1 %vm888_vm0, %v887_v0  ;;  %v740_v6 = vld [vmem:[#allocation7 + $0x8] sm:$0xff]   ;;  %v734_v7 = vld [vmem:[#allocation5 + $0x20] sm:$0xff]   ;;  %v741_v8 = vld [vmem:[#allocation7 + $0x10] sm:$0xff]   ;;  %s551_s9 = sshll.u32 %s889_s8, 4  ;;  %s552_s9 = int_to_ptr.vmem [resolvable:$true] %s551_s9 }
  0x4c   :  { %640 = vmatpush3.bf16.msra.mxu0 %v730_v1  ;;  %660 = vmatpush3.bf16.msra.mxu1 %v739_v4  ;;  %v735_v9 = vld [vmem:[#allocation5 + $0x28] sm:$0xff]   ;;  %v742_v10 = vld [vmem:[#allocation7 + $0x18] sm:$0xff]   ;;  %v736_v11 = vld [vmem:[#allocation5 + $0x30] sm:$0xff]   ;;  %p856_p5 = scmp.lt.s32.totalorder %s552_s9, %s552_s9 }
  0x4d   :  { %641 = vmatprep.subr.bf16.mxu0 %v887_v0  ;;  %661 = vmatprep.subr.bf16.mxu1 %v887_v0  ;;  %v743_v12 = vld [vmem:[#allocation7 + $0x20] sm:$0xff]   ;;  %v737_v13 = vld [vmem:[#allocation5 + $0x38] sm:$0xff]   ;;  %v744_v14 = vld [vmem:[#allocation7 + $0x28] sm:$0xff]  }
  0x4e   :  { %v738_v15 = vld [vmem:[#allocation2] sm:$0xff]   ;;  %v745_v16 = vld [vmem:[#allocation7 + $0x30] sm:$0xff]   ;;  %v747_v18 = vld [vmem:[#allocation7 + $0x40] sm:$0xff]  }
  0x4f   :  { %v746_v17 = vld [vmem:[#allocation7 + $0x38] sm:$0xff]   ;;  %v748_v19 = vld [vmem:[#allocation7 + $0x48] sm:$0xff]   ;;  %v749_v20 = vld [vmem:[#allocation7 + $0x50] sm:$0xff]  }
  0x50   :  { %642 = vmatpush3.bf16.msra.mxu0 %v731_v2  ;;  %662 = vmatpush3.bf16.msra.mxu1 %v740_v6  ;;  %v750_v21 = vld [vmem:[#allocation7 + $0x58] sm:$0xff]   ;;  %v751_v22 = vld [vmem:[#allocation7 + $0x60] sm:$0xff]   ;;  %v752_v23 = vld [vmem:[#allocation7 + $0x68] sm:$0xff]  }
  0x51   :  { %643 = vmatprep.subr.bf16.mxu0 %v887_v0  ;;  %663 = vmatprep.subr.bf16.mxu1 %v887_v0  ;;  %v565_v24 = vld [vmem:[%s1072_s2] ss:$0 sm:$0xff]  ;;  %v753_v32 = vld [vmem:[#allocation7 + $0x70] sm:$0xff]   ;;  %v755_v34 = vld [vmem:[#allocation8] sm:$0xff]  }
  0x52   :  { %v754_v33 = vld [vmem:[#allocation7 + $0x78] sm:$0xff]   ;;  %v756_v35 = vld [vmem:[#allocation8 + $0x8] sm:$0xff]   ;;  %v757_v36 = vld [vmem:[#allocation8 + $0x10] sm:$0xff]  }
  0x53   :  { %v758_v37 = vld [vmem:[#allocation8 + $0x18] sm:$0xff]   ;;  %v759_v38 = vld [vmem:[#allocation8 + $0x20] sm:$0xff]   ;;  %v760_v39 = vld [vmem:[#allocation8 + $0x28] sm:$0xff]  }
  0x54   :  { %644 = vmatpush3.bf16.msra.mxu0 %v732_v3  ;;  %664 = vmatpush3.bf16.msra.mxu1 %v741_v8  ;;  %v575_v40 = vld [vmem:[%s1074_s4] ss:$0 sm:$0xff]  ;;  %v761_v48 = vld [vmem:[#allocation8 + $0x30] sm:$0xff]   ;;  %v585_v50 = vld [vmem:[%s1074_s4 + $0x1] ss:$0 sm:$0xff]  ;;  %s851_s4 = scalar_lea.vmem %s552_s9, 256 }
  0x55   :  { %645 = vmatprep.subr.bf16.mxu0 %v887_v0  ;;  %665 = vmatprep.subr.bf16.mxu1 %v887_v0  ;;  %v762_v49 = vld [vmem:[#allocation8 + $0x38] sm:$0xff]   ;;  %p852_p4 = scmp.ne.s32.totalorder %s552_s9, %s851_s4  ;;  %p857_p6 = scmp.lt.s32.totalorder %s851_s4, %s851_s4 }
  0x56   :  { %v594_v58 = vld [vmem:[%s1076_s6] ss:$0 sm:$0xff] }
  0x57   :  { %p858_p7 = por %p857_p6, %p856_p5 }
  0x58   :  { %646 = vmatpush3.bf16.msra.mxu0 %v733_v5  ;;  %666 = vmatpush3.bf16.msra.mxu1 %v742_v10 }
  0x59   :  { %647 = vmatprep.subr.bf16.mxu0 %v887_v0  ;;  %667 = vmatprep.subr.bf16.mxu1 %v887_v0  ;;  %p859_p8 = pnand %p858_p7, %p852_p4 }
  0x5c   :  { %648 = vmatpush3.bf16.msra.mxu0 %v734_v7  ;;  %668 = vmatpush3.bf16.msra.mxu1 %v743_v12 }
  0x5d   :  { %649 = vmatprep.subr.bf16.mxu0 %v887_v0  ;;  %669 = vmatprep.subr.bf16.mxu1 %v887_v0 }
  0x60   :  { %650 = vmatpush3.bf16.msra.mxu0 %v735_v9  ;;  %670 = vmatpush3.bf16.msra.mxu1 %v744_v14 }
  0x61   :  { %651 = vmatprep.subr.bf16.mxu0 %v887_v0  ;;  %671 = vmatprep.subr.bf16.mxu1 %v887_v0 }
  0x64   :  { %652 = vmatpush3.bf16.msra.mxu0 %v736_v11  ;;  %672 = vmatpush3.bf16.msra.mxu1 %v745_v16 }
  0x65   :  { %653 = vmatprep.subr.bf16.mxu0 %v887_v0  ;;  %673 = vmatprep.subr.bf16.mxu1 %v887_v0 }
  0x68   :  { %654 = vmatpush3.bf16.msra.mxu0 %v737_v13  ;;  %674 = vmatpush3.bf16.msra.mxu1 %v746_v17 }
  0x69   :  { %679 = vmatprep.subr.bf16.mxu0 %v887_v0  ;;  %699 = vmatprep.subr.bf16.mxu1 %v887_v0 }
  0x6b   :  { %656 = vmatmul.mubr.bf16.vlgmr.msra.gmra.mrb[0].mxu0 %v738_v15 }
  0x6c   :  { %695 = vmatprep.mubr.msk.bf16.mxu0 %vm888_vm0, %v887_v0  ;;  %680 = vmatpush3.bf16.msra.mxu0 %v747_v18 }
  0x6d   :  { %681 = vmatprep.subr.bf16.mxu0 %v887_v0 }
  0x70   :  { %682 = vmatpush3.bf16.msra.mxu0 %v748_v19 }
  0x71   :  { %683 = vmatprep.subr.bf16.mxu0 %v887_v0 }
  0x74   :  { %684 = vmatpush3.bf16.msra.mxu0 %v749_v20 }
  0x75   :  { %685 = vmatprep.subr.bf16.mxu0 %v887_v0 }
  0x78   :  { %686 = vmatpush3.bf16.msra.mxu0 %v750_v21 }
  0x79   :  { %687 = vmatprep.subr.bf16.mxu0 %v887_v0 }
  0x7c   :  { %688 = vmatpush3.bf16.msra.mxu0 %v751_v22 }
  0x7d   :  { %689 = vmatprep.subr.bf16.mxu0 %v887_v0 }
  0x80   :  { %690 = vmatpush3.bf16.msra.mxu0 %v752_v23 }
  0x81   :  { %691 = vmatprep.subr.bf16.mxu0 %v887_v0 }
  0x84   :  { %692 = vmatpush3.bf16.msra.mxu0 %v753_v32 }
  0x85   :  { %693 = vmatprep.subr.bf16.mxu0 %v887_v0 }
  0x88   :  { %694 = vmatpush3.bf16.msra.mxu0 %v754_v33 }
 0x13e   :  { %v196_v25 = vpop.f32.mrb[0].mxu0 }
 0x13f   :  { %v657_v26 = vpop.f32.mrb[1].mxu0  ;;  %v197_v28 = vadd.f32 %v565_v24, %v196_v25 }
 0x140   :  { %v199_v27 = vpop.f32.mrb[2].mxu0 }
 0x141   :  { %v200_v29 = vadd.f32 %v565_v24, %v199_v27  ;;  %v658_v30 = vpop.f32.mrb[3].mxu0 }
 0x143   :  { %v203_v31 = vpack.c.bf16 %v200_v29, %v197_v28 }
 0x145   :  { %676 = vmatmul.mubr.bf16.vlgmr.msra.gmra.mrb[0].mxu1 %v203_v31 }
 0x146   :  { %715 = vmatprep.mubr.msk.bf16.mxu1 %vm888_vm0, %v887_v0  ;;  %700 = vmatpush3.bf16.msra.mxu1 %v755_v34 }
 0x147   :  { %701 = vmatprep.subr.bf16.mxu1 %v887_v0 }
 0x14a   :  { %702 = vmatpush3.bf16.msra.mxu1 %v756_v35 }
 0x14b   :  { %703 = vmatprep.subr.bf16.mxu1 %v887_v0 }
 0x14e   :  { %704 = vmatpush3.bf16.msra.mxu1 %v757_v36 }
 0x14f   :  { %705 = vmatprep.subr.bf16.mxu1 %v887_v0 }
 0x152   :  { %706 = vmatpush3.bf16.msra.mxu1 %v758_v37 }
 0x153   :  { %707 = vmatprep.subr.bf16.mxu1 %v887_v0 }
 0x156   :  { %708 = vmatpush3.bf16.msra.mxu1 %v759_v38 }
 0x157   :  { %709 = vmatprep.subr.bf16.mxu1 %v887_v0 }
 0x15a   :  { %710 = vmatpush3.bf16.msra.mxu1 %v760_v39 }
 0x15b   :  { %711 = vmatprep.subr.bf16.mxu1 %v887_v0 }
 0x15e   :  { %712 = vmatpush3.bf16.msra.mxu1 %v761_v48 }
 0x15f   :  { %713 = vmatprep.subr.bf16.mxu1 %v887_v0 }
 0x162   :  { %714 = vmatpush3.bf16.msra.mxu1 %v762_v49 }
 0x218   :  { %v309_v41 = vpop.f32.mrb[0].mxu1 }
 0x219   :  { %v677_v42 = vpop.f32.mrb[1].mxu1  ;;  %v310_v44 = vadd.f32 %v575_v40, %v309_v41 }
 0x21a   :  { %v312_v43 = vpop.f32.mrb[2].mxu1 }
 0x21b   :  { %v313_v45 = vadd.f32 %v575_v40, %v312_v43  ;;  %v678_v46 = vpop.f32.mrb[3].mxu1 }
 0x21d   :  { %v316_v47 = vpack.c.bf16 %v313_v45, %v310_v44 }
 0x21f   :  { %696 = vmatmul.mubr.bf16.vlgmr.msra.gmra.mrb[4].mxu0 %v316_v47 }
 0x2f2   :  { %v424_v51 = vpop.f32.mrb[4].mxu0 }
 0x2f3   :  { %v697_v52 = vpop.f32.mrb[5].mxu0  ;;  %v425_v54 = vadd.f32 %v585_v50, %v424_v51 }
 0x2f4   :  { %v427_v53 = vpop.f32.mrb[6].mxu0 }
 0x2f5   :  { %v428_v55 = vadd.f32 %v585_v50, %v427_v53  ;;  %v698_v56 = vpop.f32.mrb[7].mxu0 }
 0x2f7   :  { %v431_v57 = vpack.c.bf16 %v428_v55, %v425_v54 }
 0x2f9   :  { %716 = vmatmul.mubr.bf16.vlgmr.msra.gmra.mrb[4].mxu1 %v431_v57 }
 0x3cc   :  { %v537_v59 = vpop.f32.mrb[4].mxu1 }
 0x3cd   :  { %v538_v60 = vadd.f32 %v594_v58, %v537_v59  ;;  %v717_v61 = vpop.f32.mrb[5].mxu1 }
 0x3ce   :  { %v540_v62 = vpop.f32.mrb[6].mxu1 }
 0x3cf   :  { %544 = vst [vmem:[#allocation10] sm:$0xff] %v538_v60  ;;  %v541_v63 = vadd.f32 %v594_v58, %v540_v62  ;;  %v718_v0 = vpop.f32.mrb[7].mxu1 }
 0x3d1   :  { %545 = vst [vmem:[#allocation10 + $0x8] sm:$0xff] %v541_v63 }
 0x3d2   :  { %862 = shalt.err (!%p859_p8)
}
 0x3d3   :  { %s863_s11 = scalar_lea.hbm %s1077_s7, 256 }
 0x3d4   :  { %p864_p9 = scmp.ne.s32.totalorder %s1077_s7, %s863_s11  ;;  %p867_p10 = scmp.lt.u32.totalorder %s863_s11, %s1077_s7 }
 0x3d6   :  { %p869_p11 = pnand %p867_p10, %p864_p9 }
 0x3d8   :  { %872 = shalt.err (!%p869_p11)
}
 0x3d9   :  { %s890_s27 = smov 128   ;;  %s891_s17 = smov 8  }
 0x3da   :  { %557 = dma.vmem_to_hbm [thread:$0]  %s552_s9, 256, %s1077_s7, [#allocation4], %s890_s27, %s890_s27, %s891_s17  }
 0x3db   :  { %879 = dma.done.wait [#allocation4], 256  }
 0x3dc   :  { %880 = vsyncadd [#allocation4], 4294967040 }
 0x3dd   :  { %561 = vsyncpa [#allocation3], 1 }
 0x3de   :  { %562 = vsyncpa [#allocation6], 1 }
 0x3df   :  { %563 = vsyncpa [#allocation9], 1 }
 0x3e0   :  { %564 = vsyncpa [#allocation4], 1 }

</bundles_post_ra>
